<compile_context>
chip_gen: v7x
topology: tpu7x:2x2x1
jax: 0.10.0
libtpu: 0.0.40
codegen_flags: <defaults>
</compile_context>

<pallas_src>
import functools

import jax
import jax.numpy as jnp
from jax.experimental import pallas as pl
from jax.experimental.pallas import tpu as pltpu

EPS = 1e-5
MOMENTUM = 0.9  # module convention: new = momentum*old + (1-momentum)*batch


# --------------------------------------------------------------------------- #
# kernels
# --------------------------------------------------------------------------- #
def _fused_kernel(x_ref, gamma_ref, beta_ref, y_ref, mean_ref, var_ref, *,
                  eps, inv_count, hw_pad_count):
    """Single pass: stats + normalization for one channel block (full N, HW)."""
    x = x_ref[...].astype(jnp.float32)                    # (N, c_tile, HWp)
    s = jnp.sum(jnp.sum(x, axis=0), axis=1, keepdims=True)  # (c_tile, 1)
    mean = s * inv_count                                   # zero-padded cols add 0
    d = x - mean                                           # broadcast (c_tile,1)
    ss = jnp.sum(jnp.sum(d * d, axis=0), axis=1, keepdims=True)
    # padded HW columns each contributed mean^2 to ss -> subtract exactly.
    var = jnp.maximum((ss - hw_pad_count * (mean * mean)) * inv_count, 0.0)
    scale = gamma_ref[...].astype(jnp.float32) * jax.lax.rsqrt(var + eps)
    y = d * scale + beta_ref[...].astype(jnp.float32)
    y_ref[...] = y.astype(y_ref.dtype)
    mean_ref[...] = mean
    var_ref[...] = var


def _stats_kernel(x_ref, pivot_ref, sum_ref, sumsq_ref, sum_sc, sq_sc):
    """Accumulate shifted per-channel sum / sum-of-squares.

    Per-step work is pure VPU adds into (c_tile, hw_tile) f32 scratch; the
    cross-lane reduce + (c_tile,1) store happen once, on the last step.
    Grid = (split, c_blocks, n, k); (n, k) are the reduction axes.
    """
    n = pl.program_id(2)
    k = pl.program_id(3)

    @pl.when((n == 0) & (k == 0))
    def _():
        sum_sc[...] = jnp.zeros_like(sum_sc)
        sq_sc[...] = jnp.zeros_like(sq_sc)

    d = x_ref[...].astype(jnp.float32) - pivot_ref[...]    # (c_tile, hw_tile)
    sum_sc[...] += d
    sq_sc[...] += d * d

    @pl.when((n == pl.num_programs(2) - 1) & (k == pl.num_programs(3) - 1))
    def _():
        sum_ref[...] = jnp.sum(sum_sc[...], axis=1, keepdims=True)
        sumsq_ref[...] = jnp.sum(sq_sc[...], axis=1, keepdims=True)


def _norm_kernel(x_ref, scale_ref, shift_ref, y_ref):
    """y = x * scale[c] + shift[c]; scale/shift fold gamma, beta, mean, var."""
    x = x_ref[...].astype(jnp.float32)                     # (c_tile, hw_tile)
    y_ref[...] = (x * scale_ref[...] + shift_ref[...]).astype(y_ref.dtype)


# --------------------------------------------------------------------------- #
# sizing helpers
# --------------------------------------------------------------------------- #
def _vmem_capacity_bytes():
    try:
        return int(pltpu.get_tpu_info().vmem_capacity_bytes)
    except Exception:
        return 64 * 1024 * 1024       # conservative (v7x per-core VMEM)


def _sublane_multiple(itemsize):
    return {4: 8, 2: 16, 1: 32}.get(int(itemsize), 8)


def _round_up(v, m):
    return ((v + m - 1) // m) * m


def _pick_stream_tiles(c_pad, hw_pad, itemsize, target_bytes):
    """Pick (c_tile, hw_tile): grow lane axis (hw) first, then channels."""
    sub = _sublane_multiple(itemsize)
    c_tile = min(c_pad, sub)
    max_hw = max(128, target_bytes // max(1, c_tile * itemsize))
    hw_tile = 128 if hw_pad % 128 == 0 else hw_pad
    m = 128
    while m <= hw_pad:
        if hw_pad % m == 0 and m <= max_hw:
            hw_tile = m
        m += 128
    best_c = c_tile
    t = c_tile
    while t + sub <= c_pad:
        t += sub
        if c_pad % t == 0 and t * hw_tile * itemsize <= target_bytes:
            best_c = t
    return best_c, hw_tile


def _pick_fused_c_tile(c_pad, n, hw_pad, in_item, out_item, budget):
    """Largest channel tile whose full (N, c_tile, HWp) slab fits the budget."""
    sub = _sublane_multiple(in_item)
    # 2x double-buffered input + 2x double-buffered output + ~3 f32 temporaries
    per_c = n * hw_pad * (2 * in_item + 2 * out_item + 12)
    fit = [t for t in range(sub, c_pad + 1, sub)
           if c_pad % t == 0 and t * per_c <= budget]
    if not fit:
        return None
    multi = [t for t in fit if c_pad // t >= 2]   # give v7x megacore >=2 blocks
    return max(multi) if multi else max(fit)


# --------------------------------------------------------------------------- #
# wrapper
# --------------------------------------------------------------------------- #
def batch_norm_pallas(x_nchw, gamma, beta, moving_mean, moving_var,
                      eps=EPS, momentum=MOMENTUM, force_streaming=False):
    """x_nchw: (N, C, H, W); gamma/beta/moving_*: (1, C, 1, 1).

    Returns (Y (N,C,H,W), new_moving_mean (1,C,1,1), new_moving_var (1,C,1,1)).
    """
    N, C, H, W = x_nchw.shape
    HW = H * W
    K = N * HW                                 # valid element count per channel
    in_dtype = x_nchw.dtype
    in_item = int(jnp.dtype(in_dtype).itemsize)

    sub = _sublane_multiple(in_item)
    C_pad = _round_up(C, sub)
    HWp = _round_up(HW, 128)
    pad_c = C_pad - C
    pad_hw = HWp - HW

    cap = _vmem_capacity_bytes()
    vmem_limit = max(32 << 20, min(cap - (8 << 20), 100 << 20))
    budget = int(vmem_limit * 0.85)

    # Free, contiguous reshape; pad lane/sublane axes to dense multiples.
    x = x_nchw.reshape(N, C, HW)
    if pad_c or pad_hw:
        x = jnp.pad(x, ((0, 0), (0, pad_c), (0, pad_hw)))

    g = gamma.reshape(C, 1).astype(jnp.float32)
    b = beta.reshape(C, 1).astype(jnp.float32)
    if pad_c:
        g = jnp.pad(g, ((0, pad_c), (0, 0)), constant_values=1.0)
        b = jnp.pad(b, ((0, pad_c), (0, 0)))

    fused_c = None if force_streaming else _pick_fused_c_tile(
        C_pad, N, HWp, in_item, in_item, budget)

    if fused_c is not None:
        # ---------------- fused single-pass fast path ----------------------
        c_tile = fused_c
        grid = (C_pad // c_tile,)
        x_spec = pl.BlockSpec((N, c_tile, HWp), lambda c: (0, c, 0))
        col_spec = pl.BlockSpec((c_tile, 1), lambda c: (c, 0))
        kern = functools.partial(_fused_kernel, eps=float(eps),
                                 inv_count=1.0 / K,
                                 hw_pad_count=float(N * pad_hw))
        y_pad, mean_pad, var_pad = pl.pallas_call(
            kern,
            grid=grid,
            in_specs=[x_spec, col_spec, col_spec],
            out_specs=(x_spec, col_spec, col_spec),
            out_shape=(jax.ShapeDtypeStruct((N, C_pad, HWp), in_dtype),
                       jax.ShapeDtypeStruct((C_pad, 1), jnp.float32),
                       jax.ShapeDtypeStruct((C_pad, 1), jnp.float32)),
            compiler_params=pltpu.CompilerParams(
                dimension_semantics=("parallel",),
                vmem_limit_bytes=int(vmem_limit)),
            cost_estimate=pl.CostEstimate(
                flops=int(5 * N * C_pad * HWp), transcendentals=int(C_pad),
                bytes_accessed=int(2 * N * C_pad * HWp * in_item)),
        )(x, g, b)
        mean = mean_pad[:C]
        var = var_pad[:C]
        y = y_pad
    else:
        # ---------------- streaming two-pass path ---------------------------
        target = max(1 << 20, min(4 << 20, budget // 8))
        c_tile, hw_tile = _pick_stream_tiles(C_pad, HWp, in_item, target)
        c_blocks = C_pad // c_tile
        hw_blocks = HWp // hw_tile

        # If pass 1 has a single channel block, split the batch reduction in
        # two parallel halves so both v7x TensorCores get work.
        nsplit = 2 if (c_blocks == 1 and N % 2 == 0 and N >= 2) else 1
        n_per_s = N // nsplit

        # Pivot (shifted-data variance) = moving mean; must be 0 when the HW
        # axis is zero-padded so padded elements contribute exactly nothing.
        if pad_hw == 0:
            pivot = moving_mean.reshape(C, 1).astype(jnp.float32)
        else:
            pivot = jnp.zeros((C, 1), jnp.float32)
        if pad_c:
            pivot = jnp.pad(pivot, ((0, pad_c), (0, 0)))

        grid1 = (nsplit, c_blocks, n_per_s, hw_blocks)
        x_spec1 = pl.BlockSpec((None, c_tile, hw_tile),
                               lambda s, c, n, k: (s * n_per_s + n, c, k))
        piv_spec = pl.BlockSpec((c_tile, 1), lambda s, c, n, k: (c, 0))
        acc_spec = pl.BlockSpec((None, c_tile, 1), lambda s, c, n, k: (s, c, 0))

        s1, s2 = pl.pallas_call(
            _stats_kernel,
            grid=grid1,
            in_specs=[x_spec1, piv_spec],
            out_specs=(acc_spec, acc_spec),
            out_shape=(jax.ShapeDtypeStruct((nsplit, C_pad, 1), jnp.float32),
                       jax.ShapeDtypeStruct((nsplit, C_pad, 1), jnp.float32)),
            scratch_shapes=[pltpu.VMEM((c_tile, hw_tile), jnp.float32),
                            pltpu.VMEM((c_tile, hw_tile), jnp.float32)],
            compiler_params=pltpu.CompilerParams(
                dimension_semantics=("parallel", "parallel",
                                     "arbitrary", "arbitrary"),
                vmem_limit_bytes=int(vmem_limit)),
            cost_estimate=pl.CostEstimate(
                flops=int(3 * N * C_pad * HWp), transcendentals=0,
                bytes_accessed=int(N * C_pad * HWp * in_item)),
        )(x, pivot)

        # tiny per-channel glue in plain JAX (not worth a kernel)
        S1 = jnp.sum(s1, axis=0)                    # (C_pad, 1)
        S2 = jnp.sum(s2, axis=0)
        d_mean = S1 / K                             # E[x - pivot]
        mean_pad = pivot + d_mean
        var_pad = jnp.maximum(S2 / K - d_mean * d_mean, 0.0)   # biased

        inv_std = jax.lax.rsqrt(var_pad + eps)
        scale = g * inv_std
        shift = b - mean_pad * scale

        grid2 = (c_blocks, N, hw_blocks)
        x_spec2 = pl.BlockSpec((None, c_tile, hw_tile),
                               lambda c, n, k: (n, c, k))
        col_spec2 = pl.BlockSpec((c_tile, 1), lambda c, n, k: (c, 0))
        y = pl.pallas_call(
            _norm_kernel,
            grid=grid2,
            in_specs=[x_spec2, col_spec2, col_spec2],
            out_specs=x_spec2,
            out_shape=jax.ShapeDtypeStruct((N, C_pad, HWp), in_dtype),
            compiler_params=pltpu.CompilerParams(
                dimension_semantics=("parallel", "parallel", "parallel"),
                vmem_limit_bytes=int(vmem_limit)),
            cost_estimate=pl.CostEstimate(
                flops=int(2 * N * C_pad * HWp), transcendentals=0,
                bytes_accessed=int(2 * N * C_pad * HWp * in_item)),
        )(x, scale, shift)

        mean = mean_pad[:C]
        var = var_pad[:C]

    if pad_c or pad_hw:
        y = y[:, :C, :HW]
    y = y.reshape(N, C, H, W)

    # Moving-stat EMA (module semantics, biased batch variance) in the wrapper.
    mean4 = mean.reshape(1, C, 1, 1).astype(moving_mean.dtype)
    var4 = var.reshape(1, C, 1, 1).astype(moving_var.dtype)
    new_mm = momentum * moving_mean + (1.0 - momentum) * mean4
    new_mv = momentum * moving_var + (1.0 - momentum) * var4
    return y, new_mm, new_mv


# --------------------------------------------------------------------------- #
# reference + test
# --------------------------------------------------------------------------- #
def _reference(x, gamma, beta, moving_mean, moving_var, eps=EPS, momentum=MOMENTUM):
    mean = x.mean(axis=(0, 2, 3), keepdims=True)
    var = ((x - mean) ** 2).mean(axis=(0, 2, 3), keepdims=True)
    x_hat = (x - mean) / jnp.sqrt(var + eps)
    y = gamma * x_hat + beta
    nmm = momentum * moving_mean + (1.0 - momentum) * mean
    nmv = momentum * moving_var + (1.0 - momentum) * var
    return y, nmm, nmv


def _check(shape, key, force_streaming):
    N, C, H, W = shape
    # non-centered data to exercise the variance numerics
    x = jax.random.normal(key, (N, C, H, W), dtype=jnp.float32) * 2.0 + 3.0
    gamma = jnp.ones((1, C, 1, 1), dtype=jnp.float32)
    beta = jnp.zeros((1, C, 1, 1), dtype=jnp.float32)
    moving_mean = jnp.zeros((1, C, 1, 1), dtype=jnp.float32)
    moving_var = jnp.ones((1, C, 1, 1), dtype=jnp.float32)

    y, nmm, nmv = batch_norm_pallas(x, gamma, beta, moving_mean, moving_var,
                                    force_streaming=force_streaming)
    jax.block_until_ready((y, nmm, nmv))

    y_ref, mm_ref, mv_ref = _reference(x, gamma, beta, moving_mean, moving_var)
    assert jnp.allclose(y, y_ref, atol=1e-4, rtol=1e-4)
    assert jnp.allclose(nmm, mm_ref, atol=1e-4, rtol=1e-4)
    assert jnp.allclose(nmv, mv_ref, atol=1e-4, rtol=1e-4)


if __name__ == "__main__":
    key = jax.random.PRNGKey(0)
    k1, k2 = jax.random.split(key)

    # fused single-pass fast path (C padded 4->8, HW already lane-dense)
    _check((2, 4, 16, 16), k1, force_streaming=False)
    # streaming two-pass path (forced) on the same shape
    _check((2, 4, 16, 16), k1, force_streaming=True)
    # ragged spatial dims: HW=25 padded to 128, both paths
    _check((2, 4, 5, 5), k2, force_streaming=False)
    _check((2, 4, 5, 5), k2, force_streaming=True)

    # TODO(synk): eval-mode branch (not torch.is_grad_enabled()) and the 2-D
    # (num_dims=2) input case are not exercised by this training-forward kernel.
    print("KERNEL_OK")
</pallas_src>

<mosaic_0001>
module attributes {stable_mosaic.version = 11 : i64} {
  func.func @_fused_kernel(%arg0: i32, %arg1: memref<2x8x256xf32, #tpu.memory_space<vmem>>, %arg2: memref<8x1xf32, #tpu.memory_space<vmem>>, %arg3: memref<8x1xf32, #tpu.memory_space<vmem>>, %arg4: memref<2x8x256xf32, #tpu.memory_space<vmem>>, %arg5: memref<8x1xf32, #tpu.memory_space<vmem>>, %arg6: memref<8x1xf32, #tpu.memory_space<vmem>>) attributes {dimension_semantics = [#tpu.dimension_semantics<parallel>], iteration_bounds = array<i64: 1>, scalar_prefetch = 0 : i64, scratch_operands = 0 : i64, tpu.core_type = #tpu.core_type<tc>, window_params = [{transform_indices = @transform_0, window_bounds = array<i64: 2, 8, 256>}, {transform_indices = @transform_1, window_bounds = array<i64: 8, 1>}, {transform_indices = @transform_2, window_bounds = array<i64: 8, 1>}, {transform_indices = @transform_3, window_bounds = array<i64: 2, 8, 256>}, {transform_indices = @transform_4, window_bounds = array<i64: 8, 1>}, {transform_indices = @transform_5, window_bounds = array<i64: 8, 1>}]} {
    %c0 = arith.constant 0 : index
    %c0_0 = arith.constant 0 : index
    %c0_1 = arith.constant 0 : index
    %0 = vector.load %arg1[%c0, %c0_0, %c0_1] : memref<2x8x256xf32, #tpu.memory_space<vmem>>, vector<2x8x256xf32>
    %cst = arith.constant dense<0.000000e+00> : vector<8x256xf32>
    %1 = vector.multi_reduction <add>, %0, %cst [0] : vector<2x8x256xf32> to vector<8x256xf32>
    %cst_2 = arith.constant dense<0.000000e+00> : vector<8xf32>
    %2 = vector.multi_reduction <add>, %1, %cst_2 [1] : vector<8x256xf32> to vector<8xf32>
    %3 = vector.shape_cast %2 : vector<8xf32> to vector<8x1xf32>
    %cst_3 = arith.constant 0.001953125 : f32
    %4 = vector.broadcast %cst_3 : f32 to vector<8x1xf32>
    %5 = arith.mulf %3, %4 : vector<8x1xf32>
    %6 = vector.shape_cast %5 : vector<8x1xf32> to vector<1x8x1xf32>
    %7 = vector.broadcast %6 : vector<1x8x1xf32> to vector<2x8x256xf32>
    %8 = arith.subf %0, %7 : vector<2x8x256xf32>
    %9 = arith.mulf %8, %8 : vector<2x8x256xf32>
    %cst_4 = arith.constant dense<0.000000e+00> : vector<8x256xf32>
    %10 = vector.multi_reduction <add>, %9, %cst_4 [0] : vector<2x8x256xf32> to vector<8x256xf32>
    %cst_5 = arith.constant dense<0.000000e+00> : vector<8xf32>
    %11 = vector.multi_reduction <add>, %10, %cst_5 [1] : vector<8x256xf32> to vector<8xf32>
    %12 = vector.shape_cast %11 : vector<8xf32> to vector<8x1xf32>
    %13 = arith.mulf %5, %5 : vector<8x1xf32>
    %cst_6 = arith.constant 0.000000e+00 : f32
    %14 = vector.broadcast %cst_6 : f32 to vector<8x1xf32>
    %15 = arith.mulf %14, %13 : vector<8x1xf32>
    %16 = arith.subf %12, %15 : vector<8x1xf32>
    %cst_7 = arith.constant 0.001953125 : f32
    %17 = vector.broadcast %cst_7 : f32 to vector<8x1xf32>
    %18 = arith.mulf %16, %17 : vector<8x1xf32>
    %cst_8 = arith.constant 0.000000e+00 : f32
    %19 = vector.broadcast %cst_8 : f32 to vector<8x1xf32>
    %20 = arith.maximumf %18, %19 : vector<8x1xf32>
    %c0_9 = arith.constant 0 : index
    %c0_10 = arith.constant 0 : index
    %21 = vector.load %arg2[%c0_9, %c0_10] : memref<8x1xf32, #tpu.memory_space<vmem>>, vector<8x1xf32>
    %cst_11 = arith.constant 9.99999974E-6 : f32
    %22 = vector.broadcast %cst_11 : f32 to vector<8x1xf32>
    %23 = arith.addf %20, %22 : vector<8x1xf32>
    %24 = math.rsqrt %23 : vector<8x1xf32>
    %25 = arith.mulf %21, %24 : vector<8x1xf32>
    %26 = vector.shape_cast %25 : vector<8x1xf32> to vector<1x8x1xf32>
    %27 = vector.broadcast %26 : vector<1x8x1xf32> to vector<2x8x256xf32>
    %28 = arith.mulf %8, %27 : vector<2x8x256xf32>
    %c0_12 = arith.constant 0 : index
    %c0_13 = arith.constant 0 : index
    %29 = vector.load %arg3[%c0_12, %c0_13] : memref<8x1xf32, #tpu.memory_space<vmem>>, vector<8x1xf32>
    %30 = vector.shape_cast %29 : vector<8x1xf32> to vector<1x8x1xf32>
    %31 = vector.broadcast %30 : vector<1x8x1xf32> to vector<2x8x256xf32>
    %32 = arith.addf %28, %31 : vector<2x8x256xf32>
    %c0_14 = arith.constant 0 : index
    %c0_15 = arith.constant 0 : index
    %c0_16 = arith.constant 0 : index
    %33 = vector.load %arg4[%c0_14, %c0_15, %c0_16] : memref<2x8x256xf32, #tpu.memory_space<vmem>>, vector<2x8x256xf32>
    tpu.vector_store %arg4[%c0_14, %c0_15, %c0_16], %32 {strides = array<i32>} : memref<2x8x256xf32, #tpu.memory_space<vmem>>, vector<2x8x256xf32>,
    %c0_17 = arith.constant 0 : index
    %c0_18 = arith.constant 0 : index
    %34 = vector.load %arg5[%c0_17, %c0_18] : memref<8x1xf32, #tpu.memory_space<vmem>>, vector<8x1xf32>
    tpu.vector_store %arg5[%c0_17, %c0_18], %5 {strides = array<i32>} : memref<8x1xf32, #tpu.memory_space<vmem>>, vector<8x1xf32>,
    %c0_19 = arith.constant 0 : index
    %c0_20 = arith.constant 0 : index
    %35 = vector.load %arg6[%c0_19, %c0_20] : memref<8x1xf32, #tpu.memory_space<vmem>>, vector<8x1xf32>
    tpu.vector_store %arg6[%c0_19, %c0_20], %20 {strides = array<i32>} : memref<8x1xf32, #tpu.memory_space<vmem>>, vector<8x1xf32>,
    return
  }
  func.func @transform_0(%arg0: i32) -> (i32, i32, i32) {
    %c0_i32 = arith.constant 0 : i32
    %c0_i32_0 = arith.constant 0 : i32
    %c0_i32_1 = arith.constant 0 : i32
    return %c0_i32, %arg0, %c0_i32_0 : i32, i32, i32
  }
  func.func @transform_1(%arg0: i32) -> (i32, i32) {
    %c0_i32 = arith.constant 0 : i32
    %c0_i32_0 = arith.constant 0 : i32
    return %arg0, %c0_i32 : i32, i32
  }
  func.func @transform_2(%arg0: i32) -> (i32, i32) {
    %c0_i32 = arith.constant 0 : i32
    %c0_i32_0 = arith.constant 0 : i32
    return %arg0, %c0_i32 : i32, i32
  }
  func.func @transform_3(%arg0: i32) -> (i32, i32, i32) {
    %c0_i32 = arith.constant 0 : i32
    %c0_i32_0 = arith.constant 0 : i32
    %c0_i32_1 = arith.constant 0 : i32
    return %c0_i32, %arg0, %c0_i32_0 : i32, i32, i32
  }
  func.func @transform_4(%arg0: i32) -> (i32, i32) {
    %c0_i32 = arith.constant 0 : i32
    %c0_i32_0 = arith.constant 0 : i32
    return %arg0, %c0_i32 : i32, i32
  }
  func.func @transform_5(%arg0: i32) -> (i32, i32) {
    %c0_i32 = arith.constant 0 : i32
    %c0_i32_0 = arith.constant 0 : i32
    return %arg0, %c0_i32 : i32, i32
  }
}

</mosaic_0001>

<bundles_post_ra>
// kernel: tpu_custom_call.1
= control target key start
LH: loop header
LB: loop body
LE: loop exit
PB: predicated region body
PF: predicated region fallthrough
CT: control target
= control target key end

     0   :  { %11 = vsyncpa [#allocation3], 0  ;;  %s251_s0 = inlined_call_operand.hbm [shape: f32[2,8,256], index: 0, kind: input, shape index: {}]   ;;  %s252_s1 = inlined_call_operand.vmem [shape: f32[8,1], index: 1, kind: input, shape index: {}]   ;;  %s253_s2 = inlined_call_operand.vmem [shape: f32[8,1], index: 2, kind: input, shape index: {}]   ;;  %s254_s3 = inlined_call_operand.hbm [shape: f32[2,8,256], index: 3, kind: output, shape index: {0}]   ;;  %s255_s4 = inlined_call_operand.vmem [shape: f32[8,1], index: 4, kind: output, shape index: {1}]   ;;  %s256_s5 = inlined_call_operand.vmem [shape: f32[8,1], index: 5, kind: output, shape index: {2}]  }
   0x1   :  { %12 = vsyncpa [#allocation4], 0  ;;  %s172_s18 = smov [#allocation2]   ;;  %s124_s22 = scalar_lea.hbm %s251_s0, 512 }
   0x2   :  { %s18_s19 = sshll.u32 %s172_s18, 4  ;;  %p125_p0 = scmp.ne.s32.totalorder %s251_s0, %s124_s22  ;;  %s19_s19 = int_to_ptr.vmem [resolvable:$true] %s18_s19 }
   0x3   :  { %p128_p1 = scmp.lt.u32.totalorder %s124_s22, %s251_s0 }
   0x5   :  { %p130_p2 = pnand %p128_p1, %p125_p0 }
   0x7   :  { %133 = shalt.err (!%p130_p2)
}
   0x8   :  { %s134_s27 = scalar_lea.vmem %s19_s19, 512  ;;  %p139_p4 = scmp.lt.s32.totalorder %s19_s19, %s19_s19 }
   0x9   :  { %p135_p3 = scmp.ne.s32.totalorder %s19_s19, %s134_s27  ;;  %p140_p5 = scmp.lt.s32.totalorder %s134_s27, %s134_s27 }
   0xb   :  { %p141_p6 = por %p140_p5, %p139_p4 }
   0xd   :  { %p142_p7 = pnand %p141_p6, %p135_p3 }
   0xf   :  { %145 = shalt.err (!%p142_p7)
}
  0x10   :  { %s173_s28 = smov 256   ;;  %s174_s29 = smov 16  }
  0x11   :  { %24 = dma.hbm_to_vmem [thread:$0]  %s251_s0, 512, %s19_s19, [#allocation3], %s173_s28, %s173_s28, %s174_s29  }
  0x12   :  { %168 = dma.done.wait [#allocation3], 512  }
  0x13   :  { %169 = vsyncadd [#allocation3], 4294966784  ;;  %v32_v0 = vld [vmem:[#allocation2] sm:$0xff]  ;;  %v33_v1 = vld [vmem:[#allocation2 + $0x8] sm:$0xff]  ;;  %vm87_vm0 = vcmask 7168   ;;  %v175_v20 = vmov 0  }
  0x14   :  { %v34_v2 = vld [vmem:[#allocation2 + $0x10] sm:$0xff]  ;;  %v35_v3 = vld [vmem:[#allocation2 + $0x18] sm:$0xff]  ;;  %120 = vset.pattern.permute.xlu1 %v175_v20  ;;  %121 = vset.pattern.permute.xlu0 %v175_v20  ;;  %v60_v28 = vld [vmem:[%s252_s1] sm:$0xff]  ;;  %s176_s13 = smov [#allocation5]  }
  0x15   :  { %v36_v4 = vadd.f32 %v34_v2, %v32_v0  ;;  %v37_v5 = vadd.f32 %v35_v3, %v33_v1  ;;  %v73_v31 = vld [vmem:[%s253_s2] sm:$0xff]  ;;  %s95_s14 = sshll.u32 %s176_s13, 4  ;;  %s96_s14 = int_to_ptr.vmem [resolvable:$true] %s95_s14 }
  0x16   :  { %s146_s1 = scalar_lea.vmem %s96_s14, 512  ;;  %p151_p9 = scmp.lt.s32.totalorder %s96_s14, %s96_s14 }
  0x17   :  { %v38_v6 = vadd.f32 %v37_v5, %v36_v4  ;;  %p147_p8 = scmp.ne.s32.totalorder %s96_s14, %s146_s1  ;;  %p152_p10 = scmp.lt.s32.totalorder %s146_s1, %s146_s1 }
  0x19   :  { %39 = vadd.xlane.f32.xlu0 %v38_v6  ;;  %p153_p11 = por %p152_p10, %p151_p9 }
  0x1b   :  { %p154_p12 = pnand %p153_p11, %p147_p8 }
  0xa6   :  { %v40_v7 = vpop.xlane.xlu0 %39 }
  0xa7   :  { %v41_v8 = vmul.f32 0.001953125, %v40_v7 }
  0xa9   :  { %v42_v9 = vsub.f32 %v32_v0, %v41_v8  ;;  %v43_v10 = vsub.f32 %v33_v1, %v41_v8  ;;  %v44_v11 = vsub.f32 %v34_v2, %v41_v8  ;;  %v45_v12 = vsub.f32 %v35_v3, %v41_v8  ;;  %88 = vst.msk [vmem:[%s255_s4] sm:$0xff] %vm87_vm0, %v41_v8 }
  0xaa   :  { %v55_v21 = vmul.f32 %v41_v8, %v41_v8 }
  0xab   :  { %v46_v13 = vmul.f32 %v42_v9, %v42_v9  ;;  %v47_v14 = vmul.f32 %v43_v10, %v43_v10  ;;  %v48_v15 = vmul.f32 %v44_v11, %v44_v11  ;;  %v49_v16 = vmul.f32 %v45_v12, %v45_v12 }
  0xac   :  { %v56_v22 = vmul.f32 0.0, %v55_v21 }
  0xad   :  { %v50_v17 = vadd.f32 %v48_v15, %v46_v13  ;;  %v51_v18 = vadd.f32 %v49_v16, %v47_v14 }
  0xaf   :  { %v52_v19 = vadd.f32 %v51_v18, %v50_v17 }
  0xb1   :  { %53 = vadd.xlane.f32.xlu0 %v52_v19 }
 0x13e   :  { %v54_v23 = vpop.xlane.xlu0 %53 }
 0x13f   :  { %v57_v24 = vsub.f32 %v54_v23, %v56_v22 }
 0x141   :  { %v58_v25 = vmul.f32 0.001953125, %v57_v24 }
 0x143   :  { %v59_v26 = vmax.f32 %v58_v25, 0.0 }
 0x145   :  { %v61_v27 = vadd.f32 1e-05, %v59_v26  ;;  %89 = vst.msk [vmem:[%s256_s5] sm:$0xff] %vm87_vm0, %v59_v26 }
 0x147   :  { %122 = vrsqrt.f32 %v61_v27 }
 0x151   :  { %v123_v29 = vpop.eup %122 }
 0x152   :  { %v63_v30 = vmul.f32 %v123_v29, %v60_v28 }
 0x154   :  { %66 = vperm.xlu1 %120, %v63_v30  }
 0x158   :  { %76 = vperm.xlu1 %120, %v73_v31  }
 0x1d3   :  { %v67_v32 = vpop.permute.xlu1 %66 }
 0x1d4   :  { %v69_v33 = vmul.f32 %v67_v32, %v42_v9  ;;  %v70_v34 = vmul.f32 %v67_v32, %v43_v10  ;;  %v71_v35 = vmul.f32 %v67_v32, %v44_v11  ;;  %v72_v36 = vmul.f32 %v67_v32, %v45_v12 }
 0x1d7   :  { %v77_v37 = vpop.permute.xlu1 %76 }
 0x1d8   :  { %v79_v38 = vadd.f32 %v77_v37, %v69_v33  ;;  %v80_v39 = vadd.f32 %v77_v37, %v70_v34  ;;  %v81_v40 = vadd.f32 %v77_v37, %v71_v35  ;;  %v82_v41 = vadd.f32 %v77_v37, %v72_v36 }
 0x1da   :  { %83 = vst [vmem:[#allocation5] sm:$0xff] %v79_v38  ;;  %84 = vst [vmem:[#allocation5 + $0x8] sm:$0xff] %v80_v39 }
 0x1db   :  { %85 = vst [vmem:[#allocation5 + $0x10] sm:$0xff] %v81_v40  ;;  %86 = vst [vmem:[#allocation5 + $0x18] sm:$0xff] %v82_v41 }
 0x1dc   :  { %157 = shalt.err (!%p154_p12)
}
 0x1dd   :  { %s158_s15 = scalar_lea.hbm %s254_s3, 512 }
 0x1de   :  { %p159_p13 = scmp.ne.s32.totalorder %s254_s3, %s158_s15  ;;  %p162_p0 = scmp.lt.u32.totalorder %s158_s15, %s254_s3 }
 0x1e0   :  { %p164_p1 = pnand %p162_p0, %p159_p13 }
 0x1e2   :  { %167 = shalt.err (!%p164_p1)
}
 0x1e3   :  { %101 = dma.vmem_to_hbm [thread:$0]  %s96_s14, 512, %s254_s3, [#allocation4], %s173_s28, %s173_s28, %s174_s29  }
 0x1e4   :  { %170 = dma.done.wait [#allocation4], 512  }
 0x1e5   :  { %171 = vsyncadd [#allocation4], 4294966784 }
 0x1e6   :  { %113 = vsyncpa [#allocation3], 1 }
 0x1e7   :  { %114 = vsyncpa [#allocation4], 1 }

</bundles_post_ra>
